<compile_context>
chip_gen: v5e
topology: v5e:2x2
jax: 0.10.0
libtpu: 0.0.40
codegen_flags: <defaults>
</compile_context>

<pallas_src>
import functools

import jax
import jax.numpy as jnp
from jax.experimental import pallas as pl
from jax.experimental.pallas import tpu as pltpu


# ----------------------------------------------------------------------------- kernel

def _mlp_kernel(x_ref, w1_ref, b1_ref, w2_ref, b2_ref, out_ref, acc_ref):
    # Grid: (batch_tiles, hidden_tiles); the hidden axis is the fc2 reduction.
    #   x_ref : (tm, input_dim)   x dtype (f32/bf16), invariant over hidden axis
    #   w1_ref: (input_dim, th)   bf16 slab of W1 (hidden columns of this step)
    #   b1_ref: (1, th)           f32 slab of b1
    #   w2_ref: (th, out_p)       bf16 slab of W2 (hidden rows of this step)
    #   b2_ref: (1, out_p)        f32
    #   out   : (tm, out_p)       lane-dense output tile
    #   acc   : (tm, out_p)       f32 VMEM accumulator
    h_idx = pl.program_id(1)

    @pl.when(h_idx == 0)
    def _():
        acc_ref[...] = jnp.zeros_like(acc_ref)

    # fc1 slab: bf16 MXU operands (in-kernel cast of x), f32 accumulation,
    # f32 bias + ReLU epilogue.
    x_bf16 = x_ref[...].astype(jnp.bfloat16)
    h = jnp.dot(x_bf16, w1_ref[...], preferred_element_type=jnp.float32)
    h = jnp.maximum(h + b1_ref[...], 0.0)

    # fc2 partial product for this hidden slab, accumulated in f32.
    acc_ref[...] += jnp.dot(h.astype(jnp.bfloat16), w2_ref[...],
                            preferred_element_type=jnp.float32)

    @pl.when(h_idx == pl.num_programs(1) - 1)
    def _():
        o = acc_ref[...] + b2_ref[...]
        # TODO(synk): if profiling shows the f32 epilogue saturates the VPU on
        # v5e, switch to pl.reciprocal(1 + jnp.exp(-o), approx=True) (EUP slot).
        out_ref[...] = jax.nn.sigmoid(o).astype(out_ref.dtype)


# ----------------------------------------------------------------------------- helpers

def _round_up(v, m):
    return (v + m - 1) // m * m


def _pick_tm(batch):
    """Bucketed batch tile (bounded recompiles). Multiples of 16 (bf16 sublane
    packing); 128/256 for larger batches (MXU-row friendly on v5e/v6e/v7x and
    several grid steps for the pipeline / megacore sharding)."""
    if batch <= 16:
        return 16
    if batch <= 64:
        return 64
    if batch <= 512:
        return 128
    return 256


def _pick_th(hid_p):
    """Hidden-dim tile: multiple of 128 that divides the padded hidden dim
    exactly (so no ragged weight slabs), capped at 512."""
    if hid_p <= 512:
        return hid_p
    for cand in (512, 384, 256, 128):
        if hid_p % cand == 0:
            return cand
    return hid_p  # unreachable: hid_p is a multiple of 128


def prepare_params(w1, b1, w2, b2):
    """One-time (outside the hot path) pad + cast of the MLP parameters.

    w1: (input_dim, hidden_dim), b1: (hidden_dim,) or (1, hidden_dim)
    w2: (hidden_dim, output_dim), b2: (output_dim,) or (1, output_dim)

    Hidden/output dims are zero-padded to multiples of 128 (lane-dense tiles);
    weights are cast to bf16 (MXU operands), biases kept in f32 (epilogue).
    Zero padding is exact: padded hidden columns give relu(0)=0 and multiply
    zero rows of W2; padded output columns are stripped (or are sigmoid(0)=0.5
    if trim_output=False)."""
    f32, bf16 = jnp.float32, jnp.bfloat16
    input_dim, hidden_dim = w1.shape
    output_dim = w2.shape[1]
    hid_p = _round_up(hidden_dim, 128)
    out_p = _round_up(output_dim, 128)

    b1 = jnp.reshape(b1, (1, hidden_dim))
    b2 = jnp.reshape(b2, (1, output_dim))

    w1_p = jnp.zeros((input_dim, hid_p), bf16).at[:, :hidden_dim].set(w1.astype(bf16))
    b1_p = jnp.zeros((1, hid_p), f32).at[:, :hidden_dim].set(b1.astype(f32))
    w2_p = jnp.zeros((hid_p, out_p), bf16).at[:hidden_dim, :output_dim].set(w2.astype(bf16))
    b2_p = jnp.zeros((1, out_p), f32).at[:, :output_dim].set(b2.astype(f32))

    return dict(w1=w1_p, b1=b1_p, w2=w2_p, b2=b2_p,
                input_dim=input_dim, hidden_dim=hidden_dim, output_dim=output_dim,
                hid_p=hid_p, out_p=out_p)


@functools.lru_cache(maxsize=None)
def _build_call(B, input_dim, hid_p, out_p, tm, th, x_dtype_name, out_dtype_name,
                vmem_limit):
    out_dtype = jnp.dtype(out_dtype_name)
    grid = (pl.cdiv(B, tm), hid_p // th)
    return pl.pallas_call(
        _mlp_kernel,
        out_shape=jax.ShapeDtypeStruct((B, out_p), out_dtype),
        grid_spec=pltpu.PrefetchScalarGridSpec(
            num_scalar_prefetch=0,
            grid=grid,
            in_specs=[
                pl.BlockSpec((tm, input_dim), lambda i, h: (i, 0)),   # x tile (invariant over h)
                pl.BlockSpec((input_dim, th), lambda i, h: (0, h)),   # W1 slab
                pl.BlockSpec((1, th),         lambda i, h: (0, h)),   # b1 slab
                pl.BlockSpec((th, out_p),     lambda i, h: (h, 0)),   # W2 slab
                pl.BlockSpec((1, out_p),      lambda i, h: (0, 0)),   # b2
            ],
            out_specs=pl.BlockSpec((tm, out_p), lambda i, h: (i, 0)),
            scratch_shapes=[pltpu.VMEM((tm, out_p), jnp.float32)],
        ),
        compiler_params=pltpu.CompilerParams(
            dimension_semantics=("parallel", "arbitrary"),
            vmem_limit_bytes=vmem_limit,
        ),
    )


def distillation_mlp_forward(x, params, *, tm=None, th=None,
                             out_dtype=jnp.float32, trim_output=True):
    """x: (B, input_dim) float array; params: output of prepare_params()."""
    B, input_dim = x.shape
    assert input_dim == params["input_dim"], "input_dim mismatch with prepared params"
    hid_p, out_p = params["hid_p"], params["out_p"]

    if tm is None:
        tm = _pick_tm(B)
    tm = max(16, _round_up(int(tm), 16))

    if th is None:
        th = _pick_th(hid_p)
    th = min(hid_p, max(128, _round_up(int(th), 128)))
    if hid_p % th != 0:
        th = _pick_th(hid_p)

    x_bytes = jnp.dtype(x.dtype).itemsize
    out_bytes = jnp.dtype(out_dtype).itemsize
    # Double-buffered input/output tiles + f32 accumulator, with 2x headroom;
    # capped well under v7x's 64 MiB per-TC VMEM.
    vmem_need = (2 * tm * input_dim * x_bytes
                 + 2 * (input_dim * th + th * out_p) * 2
                 + 2 * (th + out_p) * 4
                 + 2 * tm * out_p * out_bytes
                 + tm * out_p * 4)
    vmem_limit = int(min(48 * 1024 * 1024, max(8 * 1024 * 1024, 2 * vmem_need)))

    fn = _build_call(B, input_dim, hid_p, out_p, tm, th,
                     jnp.dtype(x.dtype).name, jnp.dtype(out_dtype).name, vmem_limit)
    out = fn(x, params["w1"], params["b1"], params["w2"], params["b2"])

    if trim_output:
        out = out[:, :params["output_dim"]]
    return out


# ----------------------------------------------------------------------------- references

def reference_forward_f32(x, w1, b1, w2, b2):
    """Pure-f32 reference (the PyTorch module's math)."""
    h = jnp.maximum(x @ w1 + jnp.reshape(b1, (1, -1)), 0.0)
    return jax.nn.sigmoid(h @ w2 + jnp.reshape(b2, (1, -1)))


def reference_forward(x, w1, b1, w2, b2):
    """Precision-matched reference: bf16 MXU operands, f32 accumulation/epilogue."""
    h = jnp.dot(x.astype(jnp.bfloat16), w1.astype(jnp.bfloat16),
                preferred_element_type=jnp.float32)
    h = jnp.maximum(h + jnp.reshape(b1, (1, -1)).astype(jnp.float32), 0.0)
    o = jnp.dot(h.astype(jnp.bfloat16), w2.astype(jnp.bfloat16),
                preferred_element_type=jnp.float32)
    return jax.nn.sigmoid(o + jnp.reshape(b2, (1, -1)).astype(jnp.float32))


# ----------------------------------------------------------------------------- demo

if __name__ == "__main__":
    key = jax.random.PRNGKey(0)

    # ---- Test 1: small shapes from Distillation_MLP(input_dim=32, hidden=64, out=16).
    batch, input_dim, hidden_dim, output_dim = 8, 32, 64, 16
    kx, k1, kb1, k2, kb2, k3, kb3, k4, kb4, kx2 = jax.random.split(key, 10)

    x = jax.random.normal(kx, (batch, input_dim), dtype=jnp.float32)

    # PyTorch nn.Linear-style uniform init, stored pre-transposed (in, out).
    bound1 = float(input_dim) ** -0.5
    w1 = jax.random.uniform(k1, (input_dim, hidden_dim), jnp.float32, -bound1, bound1)
    b1 = jax.random.uniform(kb1, (1, hidden_dim), jnp.float32, -bound1, bound1)
    bound2 = float(hidden_dim) ** -0.5
    w2 = jax.random.uniform(k2, (hidden_dim, output_dim), jnp.float32, -bound2, bound2)
    b2 = jax.random.uniform(kb2, (1, output_dim), jnp.float32, -bound2, bound2)

    params = prepare_params(w1, b1, w2, b2)   # one-time pad/cast, outside the hot path

    out = jax.block_until_ready(distillation_mlp_forward(x, params))
    assert out.shape == (batch, output_dim)
    ref = reference_forward(x, w1, b1, w2, b2)
    assert jnp.allclose(out, ref, atol=1e-4, rtol=1e-4), "mismatch vs matched-precision reference"
    ref32 = reference_forward_f32(x, w1, b1, w2, b2)
    assert jnp.allclose(out, ref32, atol=2e-2, rtol=2e-2), "mismatch vs f32 reference"

    # ---- Test 2: ragged batch (masked last-tile writeback), multiple batch tiles,
    # and a hidden dim large enough to exercise the hidden-tiled accumulator path.
    batch2, hidden2 = 300, 256
    bound1b = float(input_dim) ** -0.5
    w1b = jax.random.uniform(k3, (input_dim, hidden2), jnp.float32, -bound1b, bound1b)
    b1b = jax.random.uniform(kb3, (1, hidden2), jnp.float32, -bound1b, bound1b)
    bound2b = float(hidden2) ** -0.5
    w2b = jax.random.uniform(k4, (hidden2, output_dim), jnp.float32, -bound2b, bound2b)
    b2b = jax.random.uniform(kb4, (1, output_dim), jnp.float32, -bound2b, bound2b)

    params2 = prepare_params(w1b, b1b, w2b, b2b)
    xb = jax.random.normal(kx2, (batch2, input_dim), dtype=jnp.float32)

    # th=128 -> 2 hidden-axis grid steps (accumulator init/finalize exercised).
    out2 = jax.block_until_ready(
        distillation_mlp_forward(xb, params2, th=128))
    assert out2.shape == (batch2, output_dim)
    ref2 = reference_forward(xb, w1b, b1b, w2b, b2b)
    assert jnp.allclose(out2, ref2, atol=1e-4, rtol=1e-4), "ragged/hidden-tiled mismatch"

    print("KERNEL_OK")
</pallas_src>

<mosaic_0001>
module attributes {stable_mosaic.version = 11 : i64} {
  func.func @_mlp_kernel(%arg0: i32, %arg1: i32, %arg2: memref<16x32xf32, #tpu.memory_space<vmem>>, %arg3: memref<32x128xbf16, #tpu.memory_space<vmem>>, %arg4: memref<1x128xf32, #tpu.memory_space<vmem>>, %arg5: memref<128x128xbf16, #tpu.memory_space<vmem>>, %arg6: memref<1x128xf32, #tpu.memory_space<vmem>>, %arg7: memref<16x128xf32, #tpu.memory_space<vmem>>, %arg8: memref<16x128xf32, #tpu.memory_space<vmem>>) attributes {dimension_semantics = [#tpu.dimension_semantics<parallel>, #tpu.dimension_semantics<arbitrary>], iteration_bounds = array<i64: 1, 1>, scalar_prefetch = 0 : i64, scratch_operands = 1 : i64, tpu.core_type = #tpu.core_type<tc>, window_params = [{transform_indices = @transform_0, window_bounds = array<i64: 16, 32>}, {transform_indices = @transform_1, window_bounds = array<i64: 32, 128>}, {transform_indices = @transform_2, window_bounds = array<i64: 1, 128>}, {transform_indices = @transform_3, window_bounds = array<i64: 128, 128>}, {pipeline_mode = #tpu.pipeline_mode<synchronous>, transform_indices = @transform_4, window_bounds = array<i64: 1, 128>}, {transform_indices = @transform_5, window_bounds = array<i64: 16, 128>}]} {
    %c0_i32 = arith.constant 0 : i32
    %0 = arith.cmpi eq, %arg1, %c0_i32 : i32
    %1 = arith.extui %0 : i1 to i32
    %c0_i32_0 = arith.constant 0 : i32
    %2 = arith.cmpi ne, %1, %c0_i32_0 : i32
    scf.if %2 {
      %cst_16 = arith.constant 0.000000e+00 : f32
      %21 = vector.broadcast %cst_16 : f32 to vector<16x128xf32>
      %c0_17 = arith.constant 0 : index
      %c0_18 = arith.constant 0 : index
      %22 = vector.load %arg8[%c0_17, %c0_18] : memref<16x128xf32, #tpu.memory_space<vmem>>, vector<16x128xf32>
      tpu.vector_store %arg8[%c0_17, %c0_18], %21 {strides = array<i32>} : memref<16x128xf32, #tpu.memory_space<vmem>>, vector<16x128xf32>,
    } else {
    }
    %c0 = arith.constant 0 : index
    %c0_1 = arith.constant 0 : index
    %3 = vector.load %arg2[%c0, %c0_1] : memref<16x32xf32, #tpu.memory_space<vmem>>, vector<16x32xf32>
    %4 = arith.truncf %3 : vector<16x32xf32> to vector<16x32xbf16>
    %c0_2 = arith.constant 0 : index
    %c0_3 = arith.constant 0 : index
    %5 = vector.load %arg3[%c0_2, %c0_3] : memref<32x128xbf16, #tpu.memory_space<vmem>>, vector<32x128xbf16>
    %cst = arith.constant dense<0.000000e+00> : vector<16x128xf32>
    %6 = tpu.matmul %4, %5, %cst {dimension_numbers = #tpu.dot_dimension_numbers<[1], [0], [0], [1], [0, 0, 1, 1], [], []>} : vector<16x32xbf16>, vector<32x128xbf16>, vector<16x128xf32> -> vector<16x128xf32>
    %c0_4 = arith.constant 0 : index
    %c0_5 = arith.constant 0 : index
    %7 = vector.load %arg4[%c0_4, %c0_5] : memref<1x128xf32, #tpu.memory_space<vmem>>, vector<1x128xf32>
    %8 = vector.broadcast %7 : vector<1x128xf32> to vector<16x128xf32>
    %9 = arith.addf %6, %8 : vector<16x128xf32>
    %cst_6 = arith.constant 0.000000e+00 : f32
    %10 = vector.broadcast %cst_6 : f32 to vector<16x128xf32>
    %11 = arith.maximumf %9, %10 : vector<16x128xf32>
    %c0_7 = arith.constant 0 : index
    %c0_8 = arith.constant 0 : index
    %12 = vector.load %arg8[%c0_7, %c0_8] : memref<16x128xf32, #tpu.memory_space<vmem>>, vector<16x128xf32>
    %13 = arith.truncf %11 : vector<16x128xf32> to vector<16x128xbf16>
    %c0_9 = arith.constant 0 : index
    %c0_10 = arith.constant 0 : index
    %14 = vector.load %arg5[%c0_9, %c0_10] : memref<128x128xbf16, #tpu.memory_space<vmem>>, vector<128x128xbf16>
    %cst_11 = arith.constant dense<0.000000e+00> : vector<16x128xf32>
    %15 = tpu.matmul %13, %14, %cst_11 {dimension_numbers = #tpu.dot_dimension_numbers<[1], [0], [0], [1], [0, 0, 1, 1], [], []>} : vector<16x128xbf16>, vector<128x128xbf16>, vector<16x128xf32> -> vector<16x128xf32>
    %16 = arith.addf %12, %15 : vector<16x128xf32>
    %c0_12 = arith.constant 0 : index
    %c0_13 = arith.constant 0 : index
    %17 = vector.load %arg8[%c0_12, %c0_13] : memref<16x128xf32, #tpu.memory_space<vmem>>, vector<16x128xf32>
    tpu.vector_store %arg8[%c0_12, %c0_13], %16 {strides = array<i32>} : memref<16x128xf32, #tpu.memory_space<vmem>>, vector<16x128xf32>,
    %c0_i32_14 = arith.constant 0 : i32
    %18 = arith.cmpi eq, %arg1, %c0_i32_14 : i32
    %19 = arith.extui %18 : i1 to i32
    %c0_i32_15 = arith.constant 0 : i32
    %20 = arith.cmpi ne, %19, %c0_i32_15 : i32
    scf.if %20 {
      %c0_16 = arith.constant 0 : index
      %c0_17 = arith.constant 0 : index
      %21 = vector.load %arg8[%c0_16, %c0_17] : memref<16x128xf32, #tpu.memory_space<vmem>>, vector<16x128xf32>
      %c0_18 = arith.constant 0 : index
      %c0_19 = arith.constant 0 : index
      %22 = vector.load %arg6[%c0_18, %c0_19] : memref<1x128xf32, #tpu.memory_space<vmem>>, vector<1x128xf32>
      %23 = vector.broadcast %22 : vector<1x128xf32> to vector<16x128xf32>
      %24 = arith.addf %21, %23 : vector<16x128xf32>
      %25 = arith.negf %24 : vector<16x128xf32>
      %26 = math.exp %25 : vector<16x128xf32>
      %cst_20 = arith.constant 1.000000e+00 : f32
      %27 = vector.broadcast %cst_20 : f32 to vector<16x128xf32>
      %28 = arith.addf %27, %26 : vector<16x128xf32>
      %29 = arith.divf %27, %28 : vector<16x128xf32>
      %c0_21 = arith.constant 0 : index
      %c0_22 = arith.constant 0 : index
      %30 = vector.load %arg7[%c0_21, %c0_22] : memref<16x128xf32, #tpu.memory_space<vmem>>, vector<16x128xf32>
      tpu.vector_store %arg7[%c0_21, %c0_22], %29 {strides = array<i32>} : memref<16x128xf32, #tpu.memory_space<vmem>>, vector<16x128xf32>,
    } else {
    }
    return
  }
  func.func @transform_0(%arg0: i32, %arg1: i32) -> (i32, i32) {
    %c0_i32 = arith.constant 0 : i32
    %c0_i32_0 = arith.constant 0 : i32
    return %arg0, %c0_i32 : i32, i32
  }
  func.func @transform_1(%arg0: i32, %arg1: i32) -> (i32, i32) {
    %c0_i32 = arith.constant 0 : i32
    %c0_i32_0 = arith.constant 0 : i32
    return %c0_i32, %arg1 : i32, i32
  }
  func.func @transform_2(%arg0: i32, %arg1: i32) -> (i32, i32) {
    %c0_i32 = arith.constant 0 : i32
    %c0_i32_0 = arith.constant 0 : i32
    return %c0_i32, %arg1 : i32, i32
  }
  func.func @transform_3(%arg0: i32, %arg1: i32) -> (i32, i32) {
    %c0_i32 = arith.constant 0 : i32
    %c0_i32_0 = arith.constant 0 : i32
    return %arg1, %c0_i32 : i32, i32
  }
  func.func @transform_4(%arg0: i32, %arg1: i32) -> (i32, i32) {
    %c0_i32 = arith.constant 0 : i32
    %c0_i32_0 = arith.constant 0 : i32
    %c0_i32_1 = arith.constant 0 : i32
    return %c0_i32, %c0_i32_0 : i32, i32
  }
  func.func @transform_5(%arg0: i32, %arg1: i32) -> (i32, i32) {
    %c0_i32 = arith.constant 0 : i32
    %c0_i32_0 = arith.constant 0 : i32
    return %arg0, %c0_i32 : i32, i32
  }
}

</mosaic_0001>

<bundles_post_ra>
// kernel: tpu_custom_call.1
= control target key start
LH: loop header
LB: loop body
LE: loop exit
PB: predicated region body
PF: predicated region fallthrough
CT: control target
= control target key end

     0   :  { %10 = vsyncpa [#allocation4], 0  ;;  %s509_s0 = inlined_call_operand.hbm [shape: f32[8,32], index: 0, kind: input, shape index: {}]   ;;  %s510_s1 = inlined_call_operand.hbm [shape: bf16[32,128], index: 1, kind: input, shape index: {}]   ;;  %s511_s2 = inlined_call_operand.vmem [shape: f32[1,128], index: 2, kind: input, shape index: {}]   ;;  %s512_s3 = inlined_call_operand.hbm [shape: bf16[128,128], index: 3, kind: input, shape index: {}]   ;;  %s513_s4 = inlined_call_operand.vmem [shape: f32[1,128], index: 4, kind: input, shape index: {}]   ;;  %s514_s5 = inlined_call_operand.hbm [shape: f32[8,128], index: 5, kind: output, shape index: {}]  }
   0x1   :  { %11 = vsyncpa [#allocation7], 0 }
   0x2   :  { %12 = vsyncpa [#allocation5], 0  ;;  %s30_s20 = sshll.u32 %s510_s1, 4  ;;  %s31_s20 = int_to_ptr.hbm [resolvable:$true] %s30_s20 }
   0x3   :  { %16 = vsyncadd [#allocation4], 128  ;;  %s447_s21 = smov [#allocation6]   ;;  %s17_s25 = sshll.u32 %s509_s0, 4  ;;  %s18_s25 = int_to_ptr.hbm [resolvable:$true] %s17_s25 }
   0x4   :  { %s32_s22 = sshll.u32 %s447_s21, 4  ;;  %s448_s26 = smov 64   ;;  %s33_s22 = int_to_ptr.vmem [resolvable:$true] %s32_s22 }
   0x5   :  { %s449_s27 = smov 4   ;;  %s450_s28 = smov [#allocation3]  }
   0x6   :  { %38 = dma.hbm_to_vmem [thread:$0]  %s31_s20, 256, %s33_s22, [#allocation7], %s448_s26, %s448_s26, %s449_s27  }
   0x7   :  { %s19_s29 = sshll.u32 %s450_s28, 4  ;;  %s451_s30 = smov 128   ;;  %s20_s29 = int_to_ptr.vmem [resolvable:$true] %s19_s29 }
   0x8   :  { %s452_s6 = smov 8   ;;  %s45_s8 = sshll.u32 %s512_s3, 4  ;;  %s46_s8 = int_to_ptr.hbm [resolvable:$true] %s45_s8 }
   0x9   :  { %25 = dma.hbm_to_vmem [thread:$0]  %s18_s25, 128, %s20_s29, [#allocation4], %s451_s30, %s451_s30, %s452_s6  }
   0xa   :  { %s453_s9 = smov [#allocation8]  }
   0xb   :  { %s47_s0 = sshll.u32 %s453_s9, 4  ;;  %s48_s0 = int_to_ptr.vmem [resolvable:$true] %s47_s0 }
   0xc   :  { %53 = dma.hbm_to_vmem [thread:$0]  %s46_s8, 1024, %s48_s0, [#allocation7], %s448_s26, %s448_s26, %s449_s27  }
   0xd   :  { %441 = dma.done.wait [#allocation4], 256  }
   0xe   :  { %442 = vsyncadd [#allocation4], 4294967040 }
   0xf   :  { %443 = dma.done.wait [#allocation7], 1280  }
  0x10   :  { %444 = vsyncadd [#allocation7], 4294966016  ;;  %v318_v0 = vld [vmem:[#allocation6 + $0x8] sm:$0xff]  ;;  %v317_v1 = vld [vmem:[#allocation6] sm:$0xff]  ;;  %vm98_vm0 = vcmask 261120  }
  0x11   :  { %v326_v2 = vld [vmem:[#allocation8 + $0x38] sm:$0xff]  ;;  %108 = vmatpush.bf16.msra.mxu0 %v318_v0  ;;  %v75_v3 = vld [vmem:[#allocation3] sm:$0xff]  ;;  %v76_v4 = vld [vmem:[#allocation3 + $0x8] sm:$0xff] }
  0x12   :  { %185 = vmatpush.bf16.msra.mxu1 %v326_v2  ;;  %v325_v5 = vld [vmem:[#allocation8 + $0x30] sm:$0xff]  ;;  %v77_v6 = vpack.c.bf16 %v76_v4, %v75_v3  ;;  %v324_v7 = vld [vmem:[#allocation8 + $0x28] sm:$0xff]  ;;  %v323_v8 = vld [vmem:[#allocation8 + $0x20] sm:$0xff] }
  0x13   :  { %v322_v9 = vld [vmem:[#allocation8 + $0x18] sm:$0xff]  ;;  %v321_v10 = vld [vmem:[#allocation8 + $0x10] sm:$0xff]  ;;  %v320_v11 = vld [vmem:[#allocation8 + $0x8] sm:$0xff] }
  0x14   :  { %v319_v12 = vld [vmem:[#allocation8] sm:$0xff] }
  0x15   :  { %109 = vmatpush.bf16.msra.mxu0 %v317_v1  ;;  %v335_v14 = vld [vmem:[%s511_s2] ss:$0 sm:$0xff] }
  0x16   :  { %186 = vmatpush.bf16.msra.mxu1 %v325_v5  ;;  %v336_v21 = vld [vmem:[%s513_s4] ss:$0 sm:$0xff] }
  0x18   :  { %282 = vmatmul.msk.bf16.vlgmr.msra.gmra.mxu0 %vm98_vm0, %v77_v6 }
  0x1a   :  { %187 = vmatpush.bf16.msra.mxu1 %v324_v7 }
  0x1e   :  { %188 = vmatpush.bf16.msra.mxu1 %v323_v8 }
  0x22   :  { %189 = vmatpush.bf16.msra.mxu1 %v322_v9 }
  0x26   :  { %190 = vmatpush.bf16.msra.mxu1 %v321_v10 }
  0x2a   :  { %191 = vmatpush.bf16.msra.mxu1 %v320_v11 }
  0x2e   :  { %192 = vmatpush.bf16.msra.mxu1 %v319_v12 }
  0x95   :  { %v111_v13 = vpop.f32.mrf.mxu0 }
  0x96   :  { %v112_v15 = vadd.f32 %v335_v14, %v111_v13 }
  0x98   :  { %v116_v18 = vmax.f32 %v112_v15, 0.0 }
  0x9d   :  { %v113_v16 = vpop.f32.mrf.mxu0 }
  0x9e   :  { %v114_v17 = vadd.f32 %v335_v14, %v113_v16 }
  0xa0   :  { %v117_v19 = vmax.f32 %v114_v17, 0.0 }
  0xa2   :  { %v120_v20 = vpack.c.bf16 %v117_v19, %v116_v18 }
  0xa4   :  { %193 = vmatmul.bf16.vlgmr.msra.gmra.mxu1 %v120_v20 }
 0x121   :  { %v194_v22 = vpop.f32.mrf.mxu1 }
 0x122   :  { %v212_v23 = vadd.f32 %v336_v21, %v194_v22 }
 0x124   :  { %v315_v24 = vmul.f32 -1.442695, %v212_v23 }
 0x126   :  { %337 = vpow2.f32 %v315_v24 }
 0x129   :  { %v196_v25 = vpop.f32.mrf.mxu1 }
 0x12a   :  { %v213_v26 = vadd.f32 %v336_v21, %v196_v25 }
 0x12c   :  { %v338_v27 = vpop.eup %337  ;;  %v316_v28 = vmul.f32 -1.442695, %v213_v26 }
 0x12d   :  { %v220_v29 = vadd.f32 1.0, %v338_v27 }
 0x12e   :  { %339 = vpow2.f32 %v316_v28 }
 0x12f   :  { %341 = vrcp.f32 %v220_v29  ;;  %v233_v35 = vand.u32 2147483648, %v220_v29  ;;  %v231_v37 = vand.u32 2147483647, %v220_v29  ;;  %vm227_vm2 = vweird.f32 %v220_v29 }
 0x131   :  { %v234_v40 = vor.u32 1.1754944e-38, %v233_v35  ;;  %vm232_vm4 = vcmp.eq.f32.partialorder %v231_v37, 8.507059e+37 }
 0x134   :  { %v340_v30 = vpop.eup %339 }
 0x135   :  { %v342_v31 = vpop.eup %341  ;;  %v221_v32 = vadd.f32 1.0, %v340_v30 }
 0x136   :  { %v223_v33 = vmul.f32 %v342_v31, %v220_v29  ;;  %vm228_vm1 = vweird.f32 %v342_v31 }
 0x137   :  { %343 = vrcp.f32 %v221_v32  ;;  %vm229_vm3 = vmor %vm227_vm2, %vm228_vm1  ;;  %v248_v45 = vand.u32 2147483648, %v221_v32  ;;  %v246_v47 = vand.u32 2147483647, %v221_v32  ;;  %vm242_vm6 = vweird.f32 %v221_v32 }
 0x138   :  { %v224_v34 = vsub.f32 1.0, %v223_v33 }
 0x139   :  { %v249_v49 = vor.u32 1.1754944e-38, %v248_v45  ;;  %vm247_vm8 = vcmp.eq.f32.partialorder %v246_v47, 8.507059e+37 }
 0x13a   :  { %v225_v36 = vmul.f32 %v342_v31, %v224_v34 }
 0x13c   :  { %v226_v38 = vadd.f32 %v342_v31, %v225_v36 }
 0x13d   :  { %v344_v39 = vpop.eup %343 }
 0x13e   :  { %v230_v41 = vsel %vm229_vm3, %v342_v31, %v226_v38  ;;  %v238_v42 = vmul.f32 %v344_v39, %v221_v32  ;;  %vm243_vm5 = vweird.f32 %v344_v39 }
 0x13f   :  { %v235_v43 = vsel %vm232_vm4, %v234_v40, %v230_v41  ;;  %vm244_vm7 = vmor %vm242_vm6, %vm243_vm5 }
 0x140   :  { %252 = vst [vmem:[#allocation9] sm:$0xff] %v235_v43  ;;  %v239_v44 = vsub.f32 1.0, %v238_v42 }
 0x142   :  { %v240_v46 = vmul.f32 %v344_v39, %v239_v44 }
 0x144   :  { %v241_v48 = vadd.f32 %v344_v39, %v240_v46 }
 0x146   :  { %v245_v50 = vsel %vm244_vm7, %v344_v39, %v241_v48 }
 0x147   :  { %v250_v51 = vsel %vm247_vm8, %v249_v49, %v245_v50 }
 0x148   :  { %253 = vst [vmem:[#allocation9 + $0x8] sm:$0xff] %v250_v51 }
 0x149   :  { %257 = vsyncadd [#allocation5], 128  ;;  %s260_s13 = sshll.u32 %s514_s5, 4  ;;  %s454_s14 = smov [#allocation9]   ;;  %s261_s13 = int_to_ptr.hbm [resolvable:$true] %s260_s13 }
 0x14a   :  { %s258_s15 = sshll.u32 %s454_s14, 4  ;;  %s259_s15 = int_to_ptr.vmem [resolvable:$true] %s258_s15 }
 0x14b   :  { %266 = dma.vmem_to_hbm [thread:$0]  %s259_s15, 128, %s261_s13, [#allocation5], %s451_s30, %s451_s30, %s452_s6  }
 0x14c   :  { %445 = dma.done.wait [#allocation5], 256  }
 0x14d   :  { %446 = vsyncadd [#allocation5], 4294967040 }
 0x14e   :  { %271 = vsyncpa [#allocation4], 1 }
 0x14f   :  { %272 = vsyncpa [#allocation7], 1 }
 0x150   :  { %273 = vsyncpa [#allocation5], 1 }

</bundles_post_ra>
